<compile_context>
chip_gen: v6e
topology: v6e:2x2x1
jax: 0.10.0
libtpu: 0.0.40
codegen_flags: <defaults>
</compile_context>

<pallas_src>
import math

import numpy as np
import jax
import jax.numpy as jnp
from jax.experimental import pallas as pl
from jax.experimental.pallas import tpu as pltpu


def _semgconv_kernel(x_ref, wstack_ref, adj_off_ref, adj_diag_ref, bias_ref, o_ref):
    # x_ref:        (M_blk, Fin)    rows = TB batch elements * J joints
    # wstack_ref:   (2*Fin, Fout)   [W0; W1] stacked along the contraction dim
    # adj_off_ref:  (M_blk, M_blk)  block-diagonal off-diagonal adjacency
    # adj_diag_ref: (M_blk, 1)      softmax(adj) diagonal, tiled over TB
    # bias_ref:     (1, Fout)
    x2 = x_ref[...]

    # Self-connection term: per-row scale (no eye, no matmul).
    xd = adj_diag_ref[...] * x2                                     # (M_blk, Fin)

    # Neighbor aggregation on the narrow Fin operand; one MXU matmul covers
    # all TB batch elements via the block-diagonal adjacency.
    xn = jnp.dot(adj_off_ref[...], x2,
                 preferred_element_type=jnp.float32).astype(x2.dtype)

    # Single fused projection, contraction depth K = 2*Fin, f32 accumulation.
    xcat = jnp.concatenate([xd, xn], axis=1)                        # (M_blk, 2*Fin)
    out = jnp.dot(xcat, wstack_ref[...],
                  preferred_element_type=jnp.float32) + bias_ref[...]

    o_ref[...] = out.astype(o_ref.dtype)


def sem_graph_conv(x, w, adj_logits, bias, *,
                   compute_dtype=jnp.float32, target_m=256):
    """x: (B, J, Fin), w: (2, Fin, Fout), adj_logits: (J, J), bias: (Fout,)."""
    B, J, Fin = x.shape
    Fout = w.shape[-1]

    # ---- Batch-invariant preprocessing hoisted out of the kernel ----------
    adj = jax.nn.softmax(adj_logits.astype(jnp.float32), axis=1)    # (J, J)
    adj_diag = jnp.diagonal(adj).reshape(J, 1)                      # (J, 1)
    adj_off = adj * (1.0 - jnp.eye(J, dtype=adj.dtype))             # zero diagonal

    # ---- Tiling: fill the MXU M dimension; pad B instead of divisor search.
    TB = max(1, target_m // J)
    while (TB * J) % 8 != 0:                 # keep sublane-aligned blocks
        TB += 1
    n_blocks = -(-B // TB)                   # cdiv
    B_pad = n_blocks * TB
    M_blk = TB * J
    # TODO(synk): for v7x pick target_m so n_blocks >= 2 (and even) so the
    # "parallel" grid axis actually shards across both TensorCores.

    # Flatten to 2-D; zero-pad the batch dimension (padded rows sliced off below).
    x2 = x.reshape(B * J, Fin)
    if B_pad != B:
        x2 = jnp.pad(x2, ((0, (B_pad - B) * J), (0, 0)))

    # Block-diagonal off-diag adjacency covering TB batch elements per step.
    adj_off_bd = jnp.kron(jnp.eye(TB, dtype=adj.dtype), adj_off)    # (M_blk, M_blk)
    adj_diag_t = jnp.tile(adj_diag, (TB, 1))                        # (M_blk, 1)
    wstack = jnp.concatenate([w[0], w[1]], axis=0)                  # (2*Fin, Fout)
    bias2d = bias.reshape(1, Fout).astype(jnp.float32)

    # Optional bf16 MXU-operand path (v5e/v6e/v7x); accumulation stays f32.
    # Note: bf16 will not meet the 1e-5 tolerance check in __main__.
    x_c = x2.astype(compute_dtype)
    wstack_c = wstack.astype(compute_dtype)
    adj_off_c = adj_off_bd.astype(compute_dtype)
    adj_diag_c = adj_diag_t.astype(compute_dtype)

    invariant = dict(pipeline_mode=pl.Buffered(1))   # single buffer for constant blocks

    out2 = pl.pallas_call(
        _semgconv_kernel,
        out_shape=jax.ShapeDtypeStruct((B_pad * J, Fout), x.dtype),
        grid_spec=pltpu.PrefetchScalarGridSpec(
            num_scalar_prefetch=0,
            grid=(n_blocks,),
            in_specs=[
                pl.BlockSpec((M_blk, Fin), lambda b: (b, 0)),                  # x (streamed)
                pl.BlockSpec((2 * Fin, Fout), lambda b: (0, 0), **invariant),  # [W0; W1]
                pl.BlockSpec((M_blk, M_blk), lambda b: (0, 0), **invariant),   # adj off-diag
                pl.BlockSpec((M_blk, 1), lambda b: (0, 0), **invariant),       # adj diag
                pl.BlockSpec((1, Fout), lambda b: (0, 0), **invariant),        # bias
            ],
            out_specs=pl.BlockSpec((M_blk, Fout), lambda b: (b, 0)),
        ),
        compiler_params=pltpu.CompilerParams(
            dimension_semantics=("parallel",)),
    )(x_c, wstack_c, adj_off_c, adj_diag_c, bias2d)

    return out2[:B * J].reshape(B, J, Fout)


def _reference(x, w, adj_logits, bias):
    adj = jax.nn.softmax(adj_logits, axis=1)
    h0 = jnp.matmul(x, w[0])
    h1 = jnp.matmul(x, w[1])
    J = adj.shape[0]
    M = jnp.eye(J, dtype=adj.dtype)
    out = jnp.matmul(adj * M, h0) + jnp.matmul(adj * (1.0 - M), h1)
    return out + bias.reshape(1, 1, -1)


if __name__ == "__main__":
    B, J, Fin, Fout = 2, 16, 32, 64

    key = jax.random.PRNGKey(0)
    k_w, k_b, k_x = jax.random.split(key, 3)

    # Parameters mirroring the module's __init__ shapes/inits.
    gain = 1.414
    bound = gain * math.sqrt(6.0 / (Fin + Fout))
    W = jax.random.uniform(k_w, (2, Fin, Fout), jnp.float32, -bound, bound)

    stdv = 1.0 / math.sqrt(Fout)
    bias = jax.random.uniform(k_b, (Fout,), jnp.float32, -stdv, stdv)

    # Static adjacency: chain graph over J nodes with self-loops.
    adj_np = np.zeros((J, J), dtype=np.float32)
    for i in range(J):
        adj_np[i, i] = 1.0
        if i + 1 < J:
            adj_np[i, i + 1] = 1.0
            adj_np[i + 1, i] = 1.0
    mask_rows, mask_cols = np.nonzero(adj_np > 0)
    nnz = mask_rows.shape[0]

    # Learnable edge weights e, init constant 1 (as in the module).
    e = jnp.ones((nnz,), jnp.float32)
    adj_logits = jnp.full((J, J), -9e15, dtype=jnp.float32)
    adj_logits = adj_logits.at[mask_rows, mask_cols].set(e)

    # Input.
    x = jax.random.normal(k_x, (B, J, Fin), jnp.float32)

    out = sem_graph_conv(x, W, adj_logits, bias)
    out = jax.block_until_ready(out)

    ref = _reference(x, W, adj_logits, bias)
    np.testing.assert_allclose(np.asarray(out), np.asarray(ref),
                               rtol=1e-5, atol=1e-5)
    print("KERNEL_OK")
</pallas_src>

<mosaic_0001>
module attributes {stable_mosaic.version = 11 : i64} {
  func.func @_semgconv_kernel(%arg0: i32, %arg1: memref<256x32xf32, #tpu.memory_space<vmem>>, %arg2: memref<64x64xf32, #tpu.memory_space<vmem>>, %arg3: memref<256x256xf32, #tpu.memory_space<vmem>>, %arg4: memref<256x1xf32, #tpu.memory_space<vmem>>, %arg5: memref<1x64xf32, #tpu.memory_space<vmem>>, %arg6: memref<256x64xf32, #tpu.memory_space<vmem>>) attributes {dimension_semantics = [#tpu.dimension_semantics<parallel>], iteration_bounds = array<i64: 1>, scalar_prefetch = 0 : i64, scratch_operands = 0 : i64, tpu.core_type = #tpu.core_type<tc>, window_params = [{transform_indices = @transform_0, window_bounds = array<i64: 256, 32>}, {pipeline_mode = #tpu.pipeline_mode<synchronous>, transform_indices = @transform_1, window_bounds = array<i64: 64, 64>}, {pipeline_mode = #tpu.pipeline_mode<synchronous>, transform_indices = @transform_2, window_bounds = array<i64: 256, 256>}, {pipeline_mode = #tpu.pipeline_mode<synchronous>, transform_indices = @transform_3, window_bounds = array<i64: 256, 1>}, {pipeline_mode = #tpu.pipeline_mode<synchronous>, transform_indices = @transform_4, window_bounds = array<i64: 1, 64>}, {transform_indices = @transform_5, window_bounds = array<i64: 256, 64>}]} {
    %c0 = arith.constant 0 : index
    %c0_0 = arith.constant 0 : index
    %0 = vector.load %arg1[%c0, %c0_0] : memref<256x32xf32, #tpu.memory_space<vmem>>, vector<256x32xf32>
    %c0_1 = arith.constant 0 : index
    %c0_2 = arith.constant 0 : index
    %1 = vector.load %arg4[%c0_1, %c0_2] : memref<256x1xf32, #tpu.memory_space<vmem>>, vector<256x1xf32>
    %2 = vector.broadcast %1 : vector<256x1xf32> to vector<256x32xf32>
    %3 = arith.mulf %2, %0 : vector<256x32xf32>
    %c0_3 = arith.constant 0 : index
    %c0_4 = arith.constant 0 : index
    %4 = vector.load %arg3[%c0_3, %c0_4] : memref<256x256xf32, #tpu.memory_space<vmem>>, vector<256x256xf32>
    %cst = arith.constant dense<0.000000e+00> : vector<256x32xf32>
    %5 = tpu.matmul %4, %0, %cst {dimension_numbers = #tpu.dot_dimension_numbers<[1], [0], [0], [1], [0, 0, 1, 1], [], []>} : vector<256x256xf32>, vector<256x32xf32>, vector<256x32xf32> -> vector<256x32xf32>
    %6 = tpu.concatenate %3, %5 in 1 : vector<256x32xf32>, vector<256x32xf32> -> vector<256x64xf32>
    %c0_5 = arith.constant 0 : index
    %c0_6 = arith.constant 0 : index
    %7 = vector.load %arg2[%c0_5, %c0_6] : memref<64x64xf32, #tpu.memory_space<vmem>>, vector<64x64xf32>
    %cst_7 = arith.constant dense<0.000000e+00> : vector<256x64xf32>
    %8 = tpu.matmul %6, %7, %cst_7 {dimension_numbers = #tpu.dot_dimension_numbers<[1], [0], [0], [1], [0, 0, 1, 1], [], []>} : vector<256x64xf32>, vector<64x64xf32>, vector<256x64xf32> -> vector<256x64xf32>
    %c0_8 = arith.constant 0 : index
    %c0_9 = arith.constant 0 : index
    %9 = vector.load %arg5[%c0_8, %c0_9] : memref<1x64xf32, #tpu.memory_space<vmem>>, vector<1x64xf32>
    %10 = vector.broadcast %9 : vector<1x64xf32> to vector<256x64xf32>
    %11 = arith.addf %8, %10 : vector<256x64xf32>
    %c0_10 = arith.constant 0 : index
    %c0_11 = arith.constant 0 : index
    %12 = vector.load %arg6[%c0_10, %c0_11] : memref<256x64xf32, #tpu.memory_space<vmem>>, vector<256x64xf32>
    tpu.vector_store %arg6[%c0_10, %c0_11], %11 {strides = array<i32>} : memref<256x64xf32, #tpu.memory_space<vmem>>, vector<256x64xf32>,
    return
  }
  func.func @transform_0(%arg0: i32) -> (i32, i32) {
    %c0_i32 = arith.constant 0 : i32
    %c0_i32_0 = arith.constant 0 : i32
    return %arg0, %c0_i32 : i32, i32
  }
  func.func @transform_1(%arg0: i32) -> (i32, i32) {
    %c0_i32 = arith.constant 0 : i32
    %c0_i32_0 = arith.constant 0 : i32
    %c0_i32_1 = arith.constant 0 : i32
    return %c0_i32, %c0_i32_0 : i32, i32
  }
  func.func @transform_2(%arg0: i32) -> (i32, i32) {
    %c0_i32 = arith.constant 0 : i32
    %c0_i32_0 = arith.constant 0 : i32
    %c0_i32_1 = arith.constant 0 : i32
    return %c0_i32, %c0_i32_0 : i32, i32
  }
  func.func @transform_3(%arg0: i32) -> (i32, i32) {
    %c0_i32 = arith.constant 0 : i32
    %c0_i32_0 = arith.constant 0 : i32
    %c0_i32_1 = arith.constant 0 : i32
    return %c0_i32, %c0_i32_0 : i32, i32
  }
  func.func @transform_4(%arg0: i32) -> (i32, i32) {
    %c0_i32 = arith.constant 0 : i32
    %c0_i32_0 = arith.constant 0 : i32
    %c0_i32_1 = arith.constant 0 : i32
    return %c0_i32, %c0_i32_0 : i32, i32
  }
  func.func @transform_5(%arg0: i32) -> (i32, i32) {
    %c0_i32 = arith.constant 0 : i32
    %c0_i32_0 = arith.constant 0 : i32
    return %arg0, %c0_i32 : i32, i32
  }
}

</mosaic_0001>

<bundles_post_ra>
// kernel: tpu_custom_call.1
= control target key start
LH: loop header
LB: loop body
LE: loop exit
PB: predicated region body
PF: predicated region fallthrough
CT: control target
= control target key end

     0   :  { %v1317_v0 = vmov 0.0   ;;  %v1318_v45 = vmov 0   ;;  %s1319_s13 = smov 32   ;;  %vm693_vm0 = vcmask 261120   ;;  %vm741_vm1 = vcmask 523264   ;;  %s2288_s0 = inlined_call_operand.vmem [shape: f32[256,32], index: 0, kind: input, shape index: {}]   ;;  %s2289_s2 = inlined_call_operand.vmem [shape: f32[256,256], index: 2, kind: input, shape index: {}]   ;;  %s2290_s3 = inlined_call_operand.vmem [shape: f32[256,1], index: 3, kind: input, shape index: {}]   ;;  %s2291_s1 = inlined_call_operand.vmem [shape: f32[64,64], index: 1, kind: input, shape index: {}]   ;;  %s2292_s4 = inlined_call_operand.vmem [shape: f32[1,64], index: 4, kind: input, shape index: {}]   ;;  %s2293_s5 = inlined_call_operand.vmem [shape: f32[256,64], index: 5, kind: output, shape index: {}]  }
   0x1   :  { %340 = vmatprep.subr.mxu0 %v1317_v0  ;;  %1236 = vmatprep.subr.mxu1 %v1317_v0  ;;  %v35_v1 = vld [vmem:[%s2288_s0 + $0x78] sm:$0xff]  ;;  %v34_v2 = vld [vmem:[%s2288_s0 + $0x70] sm:$0xff]  ;;  %v33_v3 = vld [vmem:[%s2288_s0 + $0x68] sm:$0xff] }
   0x2   :  { %341 = vmatpush1.msra.mxu0 %v35_v1  ;;  %1268 = vmatpush1.msra.mxu1 %v35_v1  ;;  %v32_v4 = vld [vmem:[%s2288_s0 + $0x60] sm:$0xff]  ;;  %v31_v5 = vld [vmem:[%s2288_s0 + $0x58] sm:$0xff]  ;;  %v30_v6 = vld [vmem:[%s2288_s0 + $0x50] sm:$0xff] }
   0x3   :  { %342 = vmatprep.subr.mxu0 %v1317_v0  ;;  %1237 = vmatprep.subr.mxu1 %v1317_v0  ;;  %v29_v7 = vld [vmem:[%s2288_s0 + $0x48] sm:$0xff]  ;;  %v1388_v8 = vld [vmem:[%s2288_s0 + $0x40] sm:$0xff]  ;;  %v1395_v9 = vld [vmem:[%s2288_s0 + $0x38] sm:$0xff] }
   0x4   :  { %343 = vmatpush1.msra.mxu0 %v34_v2  ;;  %1269 = vmatpush1.msra.mxu1 %v34_v2  ;;  %v1404_v10 = vld [vmem:[%s2288_s0 + $0x30] sm:$0xff]  ;;  %v1413_v11 = vld [vmem:[%s2288_s0 + $0x28] sm:$0xff]  ;;  %v1422_v12 = vld [vmem:[%s2288_s0 + $0x20] sm:$0xff] }
   0x5   :  { %344 = vmatprep.subr.mxu0 %v1317_v0  ;;  %1238 = vmatprep.subr.mxu1 %v1317_v0  ;;  %v1431_v13 = vld [vmem:[%s2288_s0 + $0x18] sm:$0xff]  ;;  %v1440_v14 = vld [vmem:[%s2288_s0 + $0x10] sm:$0xff]  ;;  %v1449_v15 = vld [vmem:[%s2288_s0 + $0x8] sm:$0xff] }
   0x6   :  { %345 = vmatpush1.msra.mxu0 %v33_v3  ;;  %1270 = vmatpush1.msra.mxu1 %v33_v3  ;;  %v1458_v16 = vld [vmem:[%s2288_s0] sm:$0xff]  ;;  %v51_v17 = vld [vmem:[%s2288_s0 + $0xf8] sm:$0xff]  ;;  %v50_v18 = vld [vmem:[%s2288_s0 + $0xf0] sm:$0xff] }
   0x7   :  { %346 = vmatprep.subr.mxu0 %v1317_v0  ;;  %1239 = vmatprep.subr.mxu1 %v1317_v0  ;;  %v49_v19 = vld [vmem:[%s2288_s0 + $0xe8] sm:$0xff]  ;;  %v48_v20 = vld [vmem:[%s2288_s0 + $0xe0] sm:$0xff]  ;;  %v47_v21 = vld [vmem:[%s2288_s0 + $0xd8] sm:$0xff] }
   0x8   :  { %347 = vmatpush1.msra.mxu0 %v32_v4  ;;  %1271 = vmatpush1.msra.mxu1 %v32_v4  ;;  %v1494_v22 = vld [vmem:[%s2288_s0 + $0xd0] sm:$0xff]  ;;  %v1501_v23 = vld [vmem:[%s2288_s0 + $0xc8] sm:$0xff]  ;;  %v1510_v24 = vld [vmem:[%s2288_s0 + $0xc0] sm:$0xff] }
   0x9   :  { %348 = vmatprep.subr.mxu0 %v1317_v0  ;;  %1240 = vmatprep.subr.mxu1 %v1317_v0  ;;  %v1519_v25 = vld [vmem:[%s2288_s0 + $0xb8] sm:$0xff]  ;;  %v1528_v26 = vld [vmem:[%s2288_s0 + $0xb0] sm:$0xff]  ;;  %v1537_v27 = vld [vmem:[%s2288_s0 + $0xa8] sm:$0xff] }
   0xa   :  { %349 = vmatpush1.msra.mxu0 %v31_v5  ;;  %1272 = vmatpush1.msra.mxu1 %v31_v5  ;;  %v1546_v28 = vld [vmem:[%s2288_s0 + $0xa0] sm:$0xff]  ;;  %v1555_v29 = vld [vmem:[%s2288_s0 + $0x98] sm:$0xff]  ;;  %v1564_v30 = vld [vmem:[%s2288_s0 + $0x90] sm:$0xff] }
   0xb   :  { %350 = vmatprep.subr.mxu0 %v1317_v0  ;;  %1241 = vmatprep.subr.mxu1 %v1317_v0  ;;  %v1573_v31 = vld [vmem:[%s2288_s0 + $0x88] sm:$0xff]  ;;  %v1582_v32 = vld [vmem:[%s2288_s0 + $0x80] sm:$0xff]  ;;  %v327_v37 = vld [vmem:[%s2289_s2 + $0x198] sm:$0xff] }
   0xc   :  { %351 = vmatpush1.msra.mxu0 %v30_v6  ;;  %1273 = vmatpush1.msra.mxu1 %v30_v6  ;;  %v277_v33 = vld [vmem:[%s2289_s2 + $0x8] sm:$0xff]  ;;  %v276_v35 = vld [vmem:[%s2289_s2] sm:$0xff]  ;;  %v279_v38 = vld [vmem:[%s2289_s2 + $0x18] sm:$0xff] }
   0xd   :  { %352 = vmatprep.subr.mxu0 %v1317_v0  ;;  %1242 = vmatprep.subr.mxu1 %v1317_v0  ;;  %v325_v34 = vld [vmem:[%s2289_s2 + $0x188] sm:$0xff]  ;;  %v324_v36 = vld [vmem:[%s2289_s2 + $0x180] sm:$0xff]  ;;  %v54_v39 = vld [vmem:[%s2290_s3 + $0x10] sm:$0xff] }
   0xe   :  { %353 = vmatpush1.msra.mxu0 %v29_v7  ;;  %1274 = vmatpush1.msra.mxu1 %v29_v7  ;;  %v52_v40 = vld [vmem:[%s2290_s3] sm:$0xff]  ;;  %v326_v41 = vld [vmem:[%s2289_s2 + $0x190] sm:$0xff]  ;;  %v329_v43 = vld [vmem:[%s2289_s2 + $0x1a8] sm:$0xff] }
   0xf   :  { %354 = vmatprep.subr.mxu0 %v1317_v0  ;;  %1243 = vmatprep.subr.mxu1 %v1317_v0  ;;  %v278_v42 = vld [vmem:[%s2289_s2 + $0x10] sm:$0xff]  ;;  %v281_v44 = vld [vmem:[%s2289_s2 + $0x28] sm:$0xff]  ;;  %v55_v46 = vld [vmem:[%s2290_s3 + $0x18] sm:$0xff] }
  0x10   :  { %355 = vmatpush1.msra.mxu0 %v1388_v8  ;;  %1275 = vmatpush1.msra.mxu1 %v1388_v8  ;;  %v53_v47 = vld [vmem:[%s2290_s3 + $0x8] sm:$0xff]  ;;  %v328_v48 = vld [vmem:[%s2289_s2 + $0x1a0] sm:$0xff]  ;;  %v331_v50 = vld [vmem:[%s2289_s2 + $0x1b8] sm:$0xff] }
  0x11   :  { %356 = vmatprep.subr.mxu0 %v1317_v0  ;;  %1244 = vmatprep.subr.mxu1 %v1317_v0  ;;  %v280_v49 = vld [vmem:[%s2289_s2 + $0x20] sm:$0xff]  ;;  %v283_v51 = vld [vmem:[%s2289_s2 + $0x38] sm:$0xff]  ;;  %v330_v53 = vld [vmem:[%s2289_s2 + $0x1b0] sm:$0xff] }
  0x12   :  { %357 = vmatpush1.msra.mxu0 %v1395_v9  ;;  %1276 = vmatpush1.msra.mxu1 %v1395_v9  ;;  %v56_v52 = vld [vmem:[%s2290_s3 + $0x20] sm:$0xff]  ;;  %v282_v54 = vld [vmem:[%s2289_s2 + $0x30] sm:$0xff]  ;;  %v333_v55 = vld [vmem:[%s2289_s2 + $0x1c8] sm:$0xff] }
  0x13   :  { %358 = vmatprep.subr.mxu0 %v1317_v0  ;;  %1245 = vmatprep.subr.mxu1 %v1317_v0  ;;  %v285_v56 = vld [vmem:[%s2289_s2 + $0x48] sm:$0xff]  ;;  %v332_v58 = vld [vmem:[%s2289_s2 + $0x1c0] sm:$0xff]  ;;  %v335_v60 = vld [vmem:[%s2289_s2 + $0x1d8] sm:$0xff] }
  0x14   :  { %359 = vmatpush1.msra.mxu0 %v1404_v10  ;;  %1277 = vmatpush1.msra.mxu1 %v1404_v10  ;;  %v57_v57 = vld [vmem:[%s2290_s3 + $0x28] sm:$0xff]  ;;  %v284_v59 = vld [vmem:[%s2289_s2 + $0x40] sm:$0xff]  ;;  %v287_v61 = vld [vmem:[%s2289_s2 + $0x58] sm:$0xff] }
  0x15   :  { %360 = vmatprep.subr.mxu0 %v1317_v0  ;;  %1246 = vmatprep.subr.mxu1 %v1317_v0  ;;  %v58_v62 = vld [vmem:[%s2290_s3 + $0x30] sm:$0xff]  ;;  %v337_v1 = vld [vmem:[%s2289_s2 + $0x1e8] sm:$0xff]  ;;  %v59_v3 = vld [vmem:[%s2290_s3 + $0x38] sm:$0xff] }
  0x16   :  { %361 = vmatpush1.msra.mxu0 %v1413_v11  ;;  %1278 = vmatpush1.msra.mxu1 %v1413_v11  ;;  %v334_v63 = vld [vmem:[%s2289_s2 + $0x1d0] sm:$0xff]  ;;  %v289_v2 = vld [vmem:[%s2289_s2 + $0x68] sm:$0xff]  ;;  %v336_v4 = vld [vmem:[%s2289_s2 + $0x1e0] sm:$0xff] }
  0x17   :  { %362 = vmatprep.subr.mxu0 %v1317_v0  ;;  %1247 = vmatprep.subr.mxu1 %v1317_v0  ;;  %v288_v5 = vld [vmem:[%s2289_s2 + $0x60] sm:$0xff]  ;;  %v339_v6 = vld [vmem:[%s2289_s2 + $0x1f8] sm:$0xff] }
  0x18   :  { %363 = vmatpush1.msra.mxu0 %v1422_v12  ;;  %1279 = vmatpush1.msra.mxu1 %v1422_v12  ;;  %v291_v7 = vld [vmem:[%s2289_s2 + $0x78] sm:$0xff] }
  0x19   :  { %364 = vmatprep.subr.mxu0 %v1317_v0  ;;  %1248 = vmatprep.subr.mxu1 %v1317_v0 }
  0x1a   :  { %365 = vmatpush1.msra.mxu0 %v1431_v13  ;;  %1280 = vmatpush1.msra.mxu1 %v1431_v13 }
  0x1b   :  { %366 = vmatprep.subr.mxu0 %v1317_v0  ;;  %1249 = vmatprep.subr.mxu1 %v1317_v0 }
  0x1c   :  { %367 = vmatpush1.msra.mxu0 %v1440_v14  ;;  %1281 = vmatpush1.msra.mxu1 %v1440_v14 }
  0x1d   :  { %368 = vmatprep.subr.mxu0 %v1317_v0  ;;  %1250 = vmatprep.subr.mxu1 %v1317_v0 }
  0x1e   :  { %369 = vmatpush1.msra.mxu0 %v1449_v15  ;;  %1282 = vmatpush1.msra.mxu1 %v1449_v15 }
  0x1f   :  { %370 = vmatprep.subr.mxu0 %v1317_v0  ;;  %1251 = vmatprep.subr.mxu1 %v1317_v0 }
  0x20   :  { %371 = vmatpush1.msra.mxu0 %v1458_v16  ;;  %1283 = vmatpush1.msra.mxu1 %v1458_v16 }
  0x21   :  { %372 = vmatprep.subr.mxu0 %v1317_v0  ;;  %1252 = vmatprep.subr.mxu1 %v1317_v0 }
  0x22   :  { %373 = vmatpush2.msra.mxu0 %v51_v17  ;;  %1284 = vmatpush2.msra.mxu1 %v51_v17  ;;  %v60_v17 = vld [vmem:[%s2290_s3 + $0x40] sm:$0xff] }
  0x23   :  { %374 = vmatprep.subr.mxu0 %v1317_v0  ;;  %1253 = vmatprep.subr.mxu1 %v1317_v0 }
  0x24   :  { %375 = vmatpush2.msra.mxu0 %v50_v18  ;;  %1285 = vmatpush2.msra.mxu1 %v50_v18  ;;  %v338_v18 = vld [vmem:[%s2289_s2 + $0x1f0] sm:$0xff] }
  0x25   :  { %376 = vmatprep.subr.mxu0 %v1317_v0  ;;  %1254 = vmatprep.subr.mxu1 %v1317_v0 }
  0x26   :  { %377 = vmatpush2.msra.mxu0 %v49_v19  ;;  %1286 = vmatpush2.msra.mxu1 %v49_v19  ;;  %v290_v19 = vld [vmem:[%s2289_s2 + $0x70] sm:$0xff] }
  0x27   :  { %378 = vmatprep.subr.mxu0 %v1317_v0  ;;  %1255 = vmatprep.subr.mxu1 %v1317_v0 }
  0x28   :  { %379 = vmatpush2.msra.mxu0 %v48_v20  ;;  %1287 = vmatpush2.msra.mxu1 %v48_v20  ;;  %v293_v20 = vld [vmem:[%s2289_s2 + $0x88] sm:$0xff] }
  0x29   :  { %380 = vmatprep.subr.mxu0 %v1317_v0  ;;  %1256 = vmatprep.subr.mxu1 %v1317_v0 }
  0x2a   :  { %381 = vmatpush2.msra.mxu0 %v47_v21  ;;  %1288 = vmatpush2.msra.mxu1 %v47_v21  ;;  %v61_v21 = vld [vmem:[%s2290_s3 + $0x48] sm:$0xff] }
  0x2b   :  { %382 = vmatprep.subr.mxu0 %v1317_v0  ;;  %1257 = vmatprep.subr.mxu1 %v1317_v0 }
  0x2c   :  { %383 = vmatpush2.msra.mxu0 %v1494_v22  ;;  %1289 = vmatpush2.msra.mxu1 %v1494_v22 }
  0x2d   :  { %384 = vmatprep.subr.mxu0 %v1317_v0  ;;  %1258 = vmatprep.subr.mxu1 %v1317_v0 }
  0x2e   :  { %385 = vmatpush2.msra.mxu0 %v1501_v23  ;;  %1290 = vmatpush2.msra.mxu1 %v1501_v23 }
  0x2f   :  { %386 = vmatprep.subr.mxu0 %v1317_v0  ;;  %1259 = vmatprep.subr.mxu1 %v1317_v0 }
  0x30   :  { %387 = vmatpush2.msra.mxu0 %v1510_v24  ;;  %1291 = vmatpush2.msra.mxu1 %v1510_v24 }
  0x31   :  { %388 = vmatprep.subr.mxu0 %v1317_v0  ;;  %1260 = vmatprep.subr.mxu1 %v1317_v0 }
  0x32   :  { %389 = vmatpush2.msra.mxu0 %v1519_v25  ;;  %1292 = vmatpush2.msra.mxu1 %v1519_v25 }
  0x33   :  { %390 = vmatprep.subr.mxu0 %v1317_v0  ;;  %1261 = vmatprep.subr.mxu1 %v1317_v0 }
  0x34   :  { %391 = vmatpush2.msra.mxu0 %v1528_v26  ;;  %1293 = vmatpush2.msra.mxu1 %v1528_v26 }
  0x35   :  { %392 = vmatprep.subr.mxu0 %v1317_v0  ;;  %1262 = vmatprep.subr.mxu1 %v1317_v0 }
  0x36   :  { %393 = vmatpush2.msra.mxu0 %v1537_v27  ;;  %1294 = vmatpush2.msra.mxu1 %v1537_v27 }
  0x37   :  { %394 = vmatprep.subr.mxu0 %v1317_v0  ;;  %1263 = vmatprep.subr.mxu1 %v1317_v0 }
  0x38   :  { %395 = vmatpush2.msra.mxu0 %v1546_v28  ;;  %1295 = vmatpush2.msra.mxu1 %v1546_v28 }
  0x39   :  { %396 = vmatprep.subr.mxu0 %v1317_v0  ;;  %1264 = vmatprep.subr.mxu1 %v1317_v0 }
  0x3a   :  { %397 = vmatpush2.msra.mxu0 %v1555_v29  ;;  %1296 = vmatpush2.msra.mxu1 %v1555_v29 }
  0x3b   :  { %398 = vmatprep.subr.mxu0 %v1317_v0  ;;  %1265 = vmatprep.subr.mxu1 %v1317_v0 }
  0x3c   :  { %399 = vmatpush2.msra.mxu0 %v1564_v30  ;;  %1297 = vmatpush2.msra.mxu1 %v1564_v30 }
  0x3d   :  { %400 = vmatprep.subr.mxu0 %v1317_v0  ;;  %1266 = vmatprep.subr.mxu1 %v1317_v0 }
  0x3e   :  { %401 = vmatpush2.msra.mxu0 %v1573_v31  ;;  %1298 = vmatpush2.msra.mxu1 %v1573_v31 }
  0x3f   :  { %402 = vmatprep.subr.mxu0 %v1317_v0  ;;  %1267 = vmatprep.subr.mxu1 %v1317_v0  ;;  %v286_v0 = vld [vmem:[%s2289_s2 + $0x50] sm:$0xff] }
  0x40   :  { %403 = vmatpush2.msra.mxu0 %v1582_v32  ;;  %1299 = vmatpush2.msra.mxu1 %v1582_v32 }
  0x41   :  { %404 = vmatprep.mubr.f32.mxu0 %v277_v33  ;;  %524 = vmatprep.mubr.f32.mxu1 %v325_v34  ;;  %v292_v33 = vld [vmem:[%s2289_s2 + $0x80] sm:$0xff]  ;;  %v295_v34 = vld [vmem:[%s2289_s2 + $0x98] sm:$0xff] }
  0x42   :  { %405 = vmatmul.mubr.f32.vlgmr.msra.gmra.mxu0 %v276_v35  ;;  %525 = vmatmul.mubr.f32.vlgmr.msra.gmra.mxu1 %v324_v36  ;;  %v62_v35 = vld [vmem:[%s2290_s3 + $0x50] sm:$0xff] }
  0x43   :  { %529 = vmatprep.mubr.f32.mxu1 %v327_v37  ;;  %409 = vmatprep.mubr.f32.mxu0 %v279_v38  ;;  %v294_v36 = vld [vmem:[%s2289_s2 + $0x90] sm:$0xff]  ;;  %v297_v37 = vld [vmem:[%s2289_s2 + $0xa8] sm:$0xff]  ;;  %v63_v38 = vld [vmem:[%s2290_s3 + $0x58] sm:$0xff] }
  0x44   :  { %1304 = vset.pattern.permute.xlu1 %v1318_v45  ;;  %1303 = vset.pattern.permute.xlu0 %v1318_v45  ;;  %v300_v45 = vld [vmem:[%s2289_s2 + $0xc0] sm:$0xff] }
  0x45   :  { %96 = vperm.xlu1 %1304, %v54_v39   ;;  %86 = vperm.xlu0 %1303, %v52_v40   ;;  %v296_v39 = vld [vmem:[%s2289_s2 + $0xa0] sm:$0xff]  ;;  %v299_v40 = vld [vmem:[%s2289_s2 + $0xb8] sm:$0xff] }
  0x46   :  { %530 = vmatmul.mubr.f32.gmra.mxu1 %v326_v41  ;;  %410 = vmatmul.mubr.f32.gmra.mxu0 %v278_v42  ;;  %v64_v41 = vld [vmem:[%s2290_s3 + $0x60] sm:$0xff]  ;;  %v298_v42 = vld [vmem:[%s2289_s2 + $0xb0] sm:$0xff] }
  0x47   :  { %534 = vmatprep.mubr.f32.mxu1 %v329_v43  ;;  %414 = vmatprep.mubr.f32.mxu0 %v281_v44  ;;  %v301_v43 = vld [vmem:[%s2289_s2 + $0xc8] sm:$0xff] }
  0x48   :  { %v65_v44 = vld [vmem:[%s2290_s3 + $0x68] sm:$0xff] }
  0x49   :  { %101 = vperm.xlu1 %1304, %v55_v46   ;;  %91 = vperm.xlu0 %1303, %v53_v47   ;;  %v303_v46 = vld [vmem:[%s2289_s2 + $0xd8] sm:$0xff]  ;;  %v66_v47 = vld [vmem:[%s2290_s3 + $0x70] sm:$0xff] }
  0x4a   :  { %535 = vmatmul.mubr.f32.gmra.mxu1 %v328_v48  ;;  %415 = vmatmul.mubr.f32.gmra.mxu0 %v280_v49  ;;  %v302_v48 = vld [vmem:[%s2289_s2 + $0xd0] sm:$0xff]  ;;  %v305_v49 = vld [vmem:[%s2289_s2 + $0xe8] sm:$0xff] }
  0x4b   :  { %539 = vmatprep.mubr.f32.mxu1 %v331_v50  ;;  %419 = vmatprep.mubr.f32.mxu0 %v283_v51  ;;  %v67_v50 = vld [vmem:[%s2290_s3 + $0x78] sm:$0xff]  ;;  %v304_v51 = vld [vmem:[%s2289_s2 + $0xe0] sm:$0xff] }
  0x4d   :  { %106 = vperm.xlu1 %1304, %v56_v52   ;;  %v307_v52 = vld [vmem:[%s2289_s2 + $0xf8] sm:$0xff] }
  0x4e   :  { %540 = vmatmul.mubr.f32.gmra.mxu1 %v330_v53  ;;  %420 = vmatmul.mubr.f32.gmra.mxu0 %v282_v54  ;;  %v68_v53 = vld [vmem:[%s2290_s3 + $0x80] sm:$0xff]  ;;  %v306_v54 = vld [vmem:[%s2289_s2 + $0xf0] sm:$0xff] }
  0x4f   :  { %544 = vmatprep.mubr.f32.mxu1 %v333_v55  ;;  %424 = vmatprep.mubr.f32.mxu0 %v285_v56  ;;  %v309_v55 = vld [vmem:[%s2289_s2 + $0x108] sm:$0xff] }
  0x50   :  { %v69_v56 = vld [vmem:[%s2290_s3 + $0x88] sm:$0xff] }
  0x51   :  { %111 = vperm.xlu1 %1304, %v57_v57   ;;  %v308_v57 = vld [vmem:[%s2289_s2 + $0x100] sm:$0xff] }
  0x52   :  { %545 = vmatmul.mubr.f32.gmra.mxu1 %v332_v58  ;;  %425 = vmatmul.mubr.f32.gmra.mxu0 %v284_v59  ;;  %v311_v58 = vld [vmem:[%s2289_s2 + $0x118] sm:$0xff]  ;;  %v70_v59 = vld [vmem:[%s2290_s3 + $0x90] sm:$0xff] }
  0x53   :  { %549 = vmatprep.mubr.f32.mxu1 %v335_v60  ;;  %429 = vmatprep.mubr.f32.mxu0 %v287_v61  ;;  %v310_v60 = vld [vmem:[%s2289_s2 + $0x110] sm:$0xff]  ;;  %v313_v61 = vld [vmem:[%s2289_s2 + $0x128] sm:$0xff] }
  0x55   :  { %116 = vperm.xlu1 %1304, %v58_v62   ;;  %v71_v62 = vld [vmem:[%s2290_s3 + $0x98] sm:$0xff] }
  0x56   :  { %550 = vmatmul.mubr.f32.gmra.mxu1 %v334_v63  ;;  %430 = vmatmul.mubr.f32.gmra.mxu0 %v286_v0  ;;  %v312_v63 = vld [vmem:[%s2289_s2 + $0x120] sm:$0xff]  ;;  %v315_v0 = vld [vmem:[%s2289_s2 + $0x138] sm:$0xff] }
  0x57   :  { %554 = vmatprep.mubr.f32.mxu1 %v337_v1  ;;  %434 = vmatprep.mubr.f32.mxu0 %v289_v2  ;;  %v72_v1 = vld [vmem:[%s2290_s3 + $0xa0] sm:$0xff]  ;;  %v314_v2 = vld [vmem:[%s2289_s2 + $0x130] sm:$0xff] }
  0x59   :  { %121 = vperm.xlu1 %1304, %v59_v3   ;;  %v317_v3 = vld [vmem:[%s2289_s2 + $0x148] sm:$0xff] }
  0x5a   :  { %555 = vmatmul.mubr.f32.gmra.mxu1 %v336_v4  ;;  %435 = vmatmul.mubr.f32.gmra.mxu0 %v288_v5  ;;  %v73_v4 = vld [vmem:[%s2290_s3 + $0xa8] sm:$0xff]  ;;  %v316_v5 = vld [vmem:[%s2289_s2 + $0x140] sm:$0xff] }
  0x5b   :  { %559 = vmatprep.mubr.f32.mxu1 %v339_v6  ;;  %439 = vmatprep.mubr.f32.mxu0 %v291_v7  ;;  %v319_v6 = vld [vmem:[%s2289_s2 + $0x158] sm:$0xff]  ;;  %v74_v7 = vld [vmem:[%s2290_s3 + $0xb0] sm:$0xff] }
  0x5d   :  { %126 = vperm.xlu1 %1304, %v60_v17   ;;  %v318_v17 = vld [vmem:[%s2289_s2 + $0x150] sm:$0xff] }
  0x5e   :  { %560 = vmatmul.mubr.f32.gmra.mxu1 %v338_v18  ;;  %440 = vmatmul.mubr.f32.gmra.mxu0 %v290_v19  ;;  %v321_v18 = vld [vmem:[%s2289_s2 + $0x168] sm:$0xff]  ;;  %v75_v19 = vld [vmem:[%s2290_s3 + $0xb8] sm:$0xff] }
  0x5f   :  { %444 = vmatprep.mubr.f32.mxu0 %v293_v20  ;;  %v320_v20 = vld [vmem:[%s2289_s2 + $0x160] sm:$0xff] }
  0x61   :  { %131 = vperm.xlu1 %1304, %v61_v21   ;;  %v323_v21 = vld [vmem:[%s2289_s2 + $0x178] sm:$0xff] }
  0x62   :  { %445 = vmatmul.mubr.f32.gmra.mxu0 %v292_v33  ;;  %v76_v33 = vld [vmem:[%s2290_s3 + $0xc0] sm:$0xff] }
  0x63   :  { %449 = vmatprep.mubr.f32.mxu0 %v295_v34  ;;  %v322_v34 = vld [vmem:[%s2289_s2 + $0x170] sm:$0xff] }
  0x65   :  { %136 = vperm.xlu1 %1304, %v62_v35   ;;  %v77_v35 = vld [vmem:[%s2290_s3 + $0xc8] sm:$0xff] }
  0x66   :  { %450 = vmatmul.mubr.f32.gmra.mxu0 %v294_v36  ;;  %v78_v36 = vld [vmem:[%s2290_s3 + $0xd0] sm:$0xff] }
  0x67   :  { %454 = vmatprep.mubr.f32.mxu0 %v297_v37  ;;  %v79_v37 = vld [vmem:[%s2290_s3 + $0xd8] sm:$0xff] }
  0x69   :  { %141 = vperm.xlu1 %1304, %v63_v38   ;;  %v80_v38 = vld [vmem:[%s2290_s3 + $0xe0] sm:$0xff] }
  0x6a   :  { %455 = vmatmul.mubr.f32.gmra.mxu0 %v296_v39  ;;  %v81_v39 = vld [vmem:[%s2290_s3 + $0xe8] sm:$0xff] }
  0x6b   :  { %459 = vmatprep.mubr.f32.mxu0 %v299_v40  ;;  %v82_v40 = vld [vmem:[%s2290_s3 + $0xf0] sm:$0xff] }
  0x6d   :  { %146 = vperm.xlu1 %1304, %v64_v41   ;;  %v83_v41 = vld [vmem:[%s2290_s3 + $0xf8] sm:$0xff] }
  0x6e   :  { %460 = vmatmul.mubr.f32.gmra.mxu0 %v298_v42  ;;  %v733_v42 = vld [vmem:[%s2291_s1 + $0x38] sm:$0xff] }
  0x6f   :  { %464 = vmatprep.mubr.f32.mxu0 %v301_v43  ;;  %1172 = vmatprep.subr.mxu1 %v733_v42  ;;  %v732_v43 = vld [vmem:[%s2291_s1 + $0x30] sm:$0xff] }
  0x70   :  { %1173 = vmatpush3.msra.mxu1 %v733_v42 }
  0x71   :  { %151 = vperm.xlu1 %1304, %v65_v44   ;;  %v731_v44 = vld [vmem:[%s2291_s1 + $0x28] sm:$0xff]  ;;  %1174 = vmatprep.subr.mxu1 %v732_v43 }
  0x72   :  { %465 = vmatmul.mubr.f32.gmra.mxu0 %v300_v45  ;;  %1175 = vmatpush3.msra.mxu1 %v732_v43  ;;  %v730_v45 = vld [vmem:[%s2291_s1 + $0x20] sm:$0xff] }
  0x73   :  { %469 = vmatprep.mubr.f32.mxu0 %v303_v46  ;;  %1176 = vmatprep.subr.mxu1 %v731_v44  ;;  %v729_v46 = vld [vmem:[%s2291_s1 + $0x18] sm:$0xff] }
  0x74   :  { %1177 = vmatpush3.msra.mxu1 %v731_v44 }
  0x75   :  { %156 = vperm.xlu1 %1304, %v66_v47   ;;  %1178 = vmatprep.subr.mxu1 %v730_v45  ;;  %v728_v47 = vld [vmem:[%s2291_s1 + $0x10] sm:$0xff] }
  0x76   :  { %470 = vmatmul.mubr.f32.gmra.mxu0 %v302_v48  ;;  %1179 = vmatpush3.msra.mxu1 %v730_v45  ;;  %v727_v48 = vld [vmem:[%s2291_s1 + $0x8] sm:$0xff] }
  0x77   :  { %474 = vmatprep.mubr.f32.mxu0 %v305_v49  ;;  %1180 = vmatprep.subr.mxu1 %v729_v46  ;;  %v726_v49 = vld [vmem:[%s2291_s1] sm:$0xff] }
  0x78   :  { %1181 = vmatpush3.msra.mxu1 %v729_v46 }
  0x79   :  { %161 = vperm.xlu1 %1304, %v67_v50   ;;  %1182 = vmatprep.subr.mxu1 %v728_v47 }
  0x7a   :  { %475 = vmatmul.mubr.f32.gmra.mxu0 %v304_v51  ;;  %1183 = vmatpush3.msra.mxu1 %v728_v47 }
  0x7b   :  { %479 = vmatprep.mubr.f32.mxu0 %v307_v52  ;;  %1184 = vmatprep.subr.mxu1 %v727_v48 }
  0x7c   :  { %1185 = vmatpush3.msra.mxu1 %v727_v48 }
  0x7d   :  { %166 = vperm.xlu1 %1304, %v68_v53   ;;  %1186 = vmatprep.subr.mxu1 %v726_v49 }
  0x7e   :  { %480 = vmatmul.mubr.f32.gmra.mxu0 %v306_v54  ;;  %1187 = vmatpush3.msra.mxu1 %v726_v49 }
  0x7f   :  { %484 = vmatprep.mubr.f32.mxu0 %v309_v55 }
  0x81   :  { %171 = vperm.xlu1 %1304, %v69_v56  }
  0x82   :  { %485 = vmatmul.mubr.f32.gmra.mxu0 %v308_v57 }
  0x83   :  { %489 = vmatprep.mubr.f32.mxu0 %v311_v58 }
  0x85   :  { %176 = vperm.xlu1 %1304, %v70_v59  }
  0x86   :  { %490 = vmatmul.mubr.f32.gmra.mxu0 %v310_v60 }
  0x87   :  { %494 = vmatprep.mubr.f32.mxu0 %v313_v61 }
  0x89   :  { %181 = vperm.xlu1 %1304, %v71_v62  }
  0x8a   :  { %495 = vmatmul.mubr.f32.gmra.mxu0 %v312_v63 }
  0x8b   :  { %499 = vmatprep.mubr.f32.mxu0 %v315_v0 }
  0x8d   :  { %186 = vperm.xlu1 %1304, %v72_v1  }
  0x8e   :  { %500 = vmatmul.mubr.f32.gmra.mxu0 %v314_v2 }
  0x8f   :  { %504 = vmatprep.mubr.f32.mxu0 %v317_v3 }
  0x91   :  { %191 = vperm.xlu1 %1304, %v73_v4  }
  0x92   :  { %505 = vmatmul.mubr.f32.gmra.mxu0 %v316_v5 }
  0x93   :  { %509 = vmatprep.mubr.f32.mxu0 %v319_v6 }
  0x95   :  { %196 = vperm.xlu1 %1304, %v74_v7  }
  0x96   :  { %510 = vmatmul.mubr.f32.gmra.mxu0 %v318_v17 }
  0x97   :  { %514 = vmatprep.mubr.f32.mxu0 %v321_v18 }
  0x99   :  { %201 = vperm.xlu1 %1304, %v75_v19  }
  0x9a   :  { %515 = vmatmul.mubr.f32.gmra.mxu0 %v320_v20 }
  0x9b   :  { %519 = vmatprep.mubr.f32.mxu0 %v323_v21 }
  0x9d   :  { %206 = vperm.xlu1 %1304, %v76_v33  }
  0x9e   :  { %520 = vmatmul.mubr.f32.gmra.mxu0 %v322_v34 }
  0xa1   :  { %211 = vperm.xlu1 %1304, %v77_v35  }
  0xa5   :  { %216 = vperm.xlu1 %1304, %v78_v36  }
  0xa9   :  { %221 = vperm.xlu1 %1304, %v79_v37  }
  0xad   :  { %226 = vperm.xlu1 %1304, %v80_v38  }
  0xb1   :  { %231 = vperm.xlu1 %1304, %v81_v39  }
  0xb5   :  { %236 = vperm.xlu1 %1304, %v82_v40  }
  0xb9   :  { %241 = vperm.xlu1 %1304, %v83_v41  }
  0xc0   :  { %v1924_v46 = vpop.permute.xlu1 %96 }
 0x102   :  { %v406_v50 = vpop.f32.mrf.mxu0  ;;  %v526_v51 = vpop.f32.mrf.mxu1 }
 0x103   :  { %597 = vrot.lane.b32.xlu0 %v406_v50, %s1319_s13  ;;  %v1928_v50 = vpop.permute.xlu1 %101 }
 0x104   :  { %v408_v52 = vpop.f32.mrf.mxu0  ;;  %v528_v53 = vpop.f32.mrf.mxu1 }
 0x106   :  { %v531_v54 = vpop.f32.mrf.mxu1  ;;  %v411_v55 = vpop.f32.mrf.mxu0 }
 0x107   :  { %645 = vrot.lane.b32.xlu0 %v526_v51, %s1319_s13 }
 0x108   :  { %v533_v56 = vpop.f32.mrf.mxu1  ;;  %v413_v57 = vpop.f32.mrf.mxu0 }
 0x10a   :  { %v1904_v58 = vpop.f32.mrf.mxu1  ;;  %v416_v59 = vpop.f32.mrf.mxu0 }
 0x10b   :  { %599 = vrot.lane.b32.xlu0 %v411_v55, %s1319_s13 }
 0x10c   :  { %v538_v60 = vpop.f32.mrf.mxu1  ;;  %v418_v61 = vpop.f32.mrf.mxu0 }
 0x10e   :  { %v1907_v62 = vpop.f32.mrf.mxu1  ;;  %v421_v63 = vpop.f32.mrf.mxu0 }
 0x10f   :  { %647 = vrot.lane.b32.xlu0 %v531_v54, %s1319_s13  ;;  %v1931_v54 = vpop.permute.xlu1 %106 }
 0x110   :  { %v543_v0 = vpop.f32.mrf.mxu1  ;;  %v423_v1 = vpop.f32.mrf.mxu0 }
 0x112   :  { %v1910_v2 = vpop.f32.mrf.mxu1  ;;  %v426_v3 = vpop.f32.mrf.mxu0 }
 0x113   :  { %601 = vrot.lane.b32.xlu0 %v416_v59, %s1319_s13  ;;  %v1935_v59 = vpop.permute.xlu1 %111 }
 0x114   :  { %v548_v4 = vpop.f32.mrf.mxu1  ;;  %v428_v5 = vpop.f32.mrf.mxu0 }
 0x116   :  { %v551_v6 = vpop.f32.mrf.mxu1  ;;  %v431_v7 = vpop.f32.mrf.mxu0 }
 0x117   :  { %655 = vrot.lane.b32.xlu1 %v551_v6, %s1319_s13  ;;  %603 = vrot.lane.b32.xlu0 %v421_v63, %s1319_s13  ;;  %v1938_v0 = vpop.permute.xlu1 %116 }
 0x118   :  { %v553_v17 = vpop.f32.mrf.mxu1  ;;  %v433_v18 = vpop.f32.mrf.mxu0 }
 0x11a   :  { %v1915_v19 = vpop.f32.mrf.mxu1  ;;  %v436_v20 = vpop.f32.mrf.mxu0 }
 0x11b   :  { %605 = vrot.lane.b32.xlu0 %v426_v3, %s1319_s13  ;;  %v1942_v5 = vpop.permute.xlu1 %121 }
 0x11c   :  { %v558_v21 = vpop.f32.mrf.mxu1  ;;  %v438_v33 = vpop.f32.mrf.mxu0 }
 0x11e   :  { %v561_v34 = vpop.f32.mrf.mxu1  ;;  %v441_v35 = vpop.f32.mrf.mxu0 }
 0x11f   :  { %659 = vrot.lane.b32.xlu1 %v561_v34, %s1319_s13  ;;  %607 = vrot.lane.b32.xlu0 %v431_v7, %s1319_s13  ;;  %v1945_v18 = vpop.permute.xlu1 %126 }
 0x120   :  { %v443_v36 = vpop.f32.mrf.mxu0  ;;  %v563_v37 = vpop.f32.mrf.mxu1 }
 0x122   :  { %v446_v38 = vpop.f32.mrf.mxu0 }
 0x123   :  { %609 = vrot.lane.b32.xlu0 %v436_v20, %s1319_s13  ;;  %v1949_v34 = vpop.permute.xlu1 %131 }
 0x124   :  { %v448_v39 = vpop.f32.mrf.mxu0 }
 0x126   :  { %v451_v40 = vpop.f32.mrf.mxu0 }
 0x127   :  { %611 = vrot.lane.b32.xlu0 %v441_v35, %s1319_s13 }
 0x128   :  { %v453_v41 = vpop.f32.mrf.mxu0 }
 0x12a   :  { %v456_v42 = vpop.f32.mrf.mxu0 }
 0x12b   :  { %613 = vrot.lane.b32.xlu0 %v446_v38, %s1319_s13  ;;  %v1952_v38 = vpop.permute.xlu1 %136 }
 0x12c   :  { %v458_v43 = vpop.f32.mrf.mxu0 }
 0x12e   :  { %v461_v44 = vpop.f32.mrf.mxu0 }
 0x12f   :  { %615 = vrot.lane.b32.xlu0 %v451_v40, %s1319_s13  ;;  %v1956_v39 = vpop.permute.xlu1 %141  ;;  %v87_v40 = vpop.permute.xlu0 %86 }
 0x130   :  { %v463_v45 = vpop.f32.mrf.mxu0 }
 0x132   :  { %v466_v47 = vpop.f32.mrf.mxu0 }
 0x133   :  { %617 = vrot.lane.b32.xlu0 %v456_v42, %s1319_s13  ;;  %v1960_v41 = vpop.permute.xlu1 %146  ;;  %v92_v42 = vpop.permute.xlu0 %91 }
 0x134   :  { %v468_v48 = vpop.f32.mrf.mxu0 }
 0x136   :  { %v471_v49 = vpop.f32.mrf.mxu0 }
 0x137   :  { %619 = vrot.lane.b32.xlu0 %v461_v44, %s1319_s13  ;;  %v1966_v43 = vpop.permute.xlu1 %151  ;;  %v244_v44 = vmul.f32 %v87_v40, %v1458_v16 }
 0x138   :  { %v473_v51 = vpop.f32.mrf.mxu0 }
 0x13a   :  { %v476_v52 = vpop.f32.mrf.mxu0 }
 0x13b   :  { %621 = vrot.lane.b32.xlu0 %v466_v47, %s1319_s13 }
 0x13c   :  { %v478_v53 = vpop.f32.mrf.mxu0 }
 0x13e   :  { %v481_v55 = vpop.f32.mrf.mxu0 }
 0x13f   :  { %623 = vrot.lane.b32.xlu0 %v471_v49, %s1319_s13 }
 0x140   :  { %v483_v56 = vpop.f32.mrf.mxu0 }
 0x142   :  { %v486_v57 = vpop.f32.mrf.mxu0 }
 0x143   :  { %625 = vrot.lane.b32.xlu0 %v476_v52, %s1319_s13 }
 0x144   :  { %v488_v60 = vpop.f32.mrf.mxu0 }
 0x145   :  { %v248_v60 = vmul.f32 %v1931_v54, %v1422_v12  ;;  %v250_v12 = vmul.f32 %v1938_v0, %v1404_v10  ;;  %v1305_v0 = vld [vmem:[%s2288_s0 + $0x48] sm:$0xff] }
 0x146   :  { %v491_v61 = vpop.f32.mrf.mxu0 }
 0x147   :  { %627 = vrot.lane.b32.xlu0 %v481_v55, %s1319_s13 }
 0x148   :  { %v493_v63 = vpop.f32.mrf.mxu0 }
 0x149   :  { %v249_v63 = vmul.f32 %v1935_v59, %v1413_v11 }
 0x14a   :  { %v496_v1 = vpop.f32.mrf.mxu0 }
 0x14b   :  { %629 = vrot.lane.b32.xlu0 %v486_v57, %s1319_s13 }
 0x14c   :  { %v498_v3 = vpop.f32.mrf.mxu0 }
 0x14e   :  { %v501_v4 = vpop.f32.mrf.mxu0 }
 0x14f   :  { %631 = vrot.lane.b32.xlu0 %v491_v61, %s1319_s13 }
 0x150   :  { %v503_v6 = vpop.f32.mrf.mxu0 }
 0x152   :  { %v506_v7 = vpop.f32.mrf.mxu0 }
 0x153   :  { %633 = vrot.lane.b32.xlu0 %v496_v1, %s1319_s13 }
 0x154   :  { %v508_v17 = vpop.f32.mrf.mxu0 }
 0x156   :  { %v511_v20 = vpop.f32.mrf.mxu0 }
 0x157   :  { %635 = vrot.lane.b32.xlu0 %v501_v4, %s1319_s13  ;;  %v251_v4 = vmul.f32 %v1942_v5, %v1395_v9  ;;  %v253_v9 = vmul.f32 %v1305_v0, %v1949_v34  ;;  %v1307_v34 = vld [vmem:[%s2288_s0 + $0x58] sm:$0xff] }
 0x158   :  { %v513_v21 = vpop.f32.mrf.mxu0 }
 0x15a   :  { %v516_v33 = vpop.f32.mrf.mxu0 }
 0x15b   :  { %637 = vrot.lane.b32.xlu0 %v506_v7, %s1319_s13  ;;  %v252_v7 = vmul.f32 %v1945_v18, %v1388_v8  ;;  %v1306_v8 = vld [vmem:[%s2288_s0 + $0x50] sm:$0xff] }
 0x15c   :  { %v518_v35 = vpop.f32.mrf.mxu0  ;;  %v254_v18 = vmul.f32 %v1306_v8, %v1952_v38  ;;  %v1308_v38 = vld [vmem:[%s2288_s0 + $0x60] sm:$0xff] }
 0x15e   :  { %v521_v36 = vpop.f32.mrf.mxu0 }
 0x15f   :  { %639 = vrot.lane.b32.xlu0 %v511_v20, %s1319_s13 }
 0x160   :  { %v523_v37 = vpop.f32.mrf.mxu0 }
 0x161   :  { %v255_v37 = vmul.f32 %v1307_v34, %v1956_v39  ;;  %v1309_v39 = vld [vmem:[%s2288_s0 + $0x68] sm:$0xff] }
 0x163   :  { %641 = vrot.lane.b32.xlu0 %v516_v33, %s1319_s13 }
 0x167   :  { %643 = vrot.lane.b32.xlu0 %v521_v36, %s1319_s13 }
 0x16b   :  { %649 = vrot.lane.b32.xlu0 %v1904_v58, %s1319_s13 }
 0x16f   :  { %651 = vrot.lane.b32.xlu0 %v1907_v62, %s1319_s13  ;;  %v1975_v62 = vpop.permute.xlu1 %156 }
 0x173   :  { %653 = vrot.lane.b32.xlu0 %v1910_v2, %s1319_s13  ;;  %v245_v2 = vmul.f32 %v92_v42, %v1449_v15  ;;  %v1980_v16 = vpop.permute.xlu1 %161  ;;  %v247_v15 = vmul.f32 %v1928_v50, %v1431_v13 }
 0x175   :  { %v598_v45 = vpop.permute.xlu0 %597 }
 0x176   :  { %v694_v47 = vsel %vm693_vm0, %v244_v44, %v598_v45  ;;  %v256_v45 = vmul.f32 %v1308_v38, %v1960_v41  ;;  %v1310_v41 = vld [vmem:[%s2288_s0 + $0x70] sm:$0xff] }
 0x177   :  { %657 = vrot.lane.b32.xlu0 %v1915_v19, %s1319_s13  ;;  %1188 = vmatprep.mubr.msk.f32.mxu1 %vm741_vm1, %v694_v47  ;;  %v246_v19 = vmul.f32 %v1924_v46, %v1440_v14  ;;  %v1986_v53 = vpop.permute.xlu1 %166 }
 0x179   :  { %v1973_v58 = vpop.permute.xlu0 %645 }
 0x17b   :  { %v1996_v61 = vpop.permute.xlu1 %171 }
 0x17d   :  { %v600_v48 = vpop.permute.xlu0 %599 }
 0x17e   :  { %v695_v49 = vsel %vm693_vm0, %v245_v2, %v600_v48  ;;  %v257_v48 = vmul.f32 %v1309_v39, %v1966_v43  ;;  %v1311_v43 = vld [vmem:[%s2288_s0 + $0x78] sm:$0xff]  ;;  %v1315_v39 = vld [vmem:[%s2288_s0 + $0xf0] sm:$0xff] }
 0x17f   :  { %1189 = vmatmul.mubr.msk.f32.vlgmr.msra.gmra.mxu1 %vm741_vm1, %v695_v49  ;;  %v2002_v13 = vpop.permute.xlu1 %176 }
 0x181   :  { %v1982_v51 = vpop.permute.xlu0 %647 }
 0x183   :  { %v182_v6 = vpop.permute.xlu1 %181 }
 0x185   :  { %v602_v52 = vpop.permute.xlu0 %601 }
 0x186   :  { %v696_v55 = vsel %vm693_vm0, %v246_v19, %v602_v52 }
 0x187   :  { %1191 = vmatprep.mubr.msk.f32.mxu1 %vm741_vm1, %v696_v55  ;;  %v187_v20 = vpop.permute.xlu1 %186  ;;  %v258_v55 = vmul.f32 %v1310_v41, %v1975_v62  ;;  %v260_v62 = vmul.f32 %v1986_v53, %v1582_v32  ;;  %v263_v53 = vmul.f32 %v182_v6, %v1555_v29 }
 0x189   :  { %v604_v56 = vpop.permute.xlu0 %603 }
 0x18a   :  { %v697_v57 = vsel %vm693_vm0, %v247_v15, %v604_v56 }
 0x18b   :  { %1192 = vmatmul.mubr.msk.f32.gmra.mxu1 %vm741_vm1, %v697_v57  ;;  %v192_v33 = vpop.permute.xlu1 %191 }
 0x18d   :  { %v606_v14 = vpop.permute.xlu0 %605 }
 0x18e   :  { %v698_v46 = vsel %vm693_vm0, %v248_v60, %v606_v14  ;;  %v259_v60 = vmul.f32 %v1311_v43, %v1980_v16 }
 0x18f   :  { %1194 = vmatprep.mubr.msk.f32.mxu1 %vm741_vm1, %v698_v46  ;;  %v197_v42 = vpop.permute.xlu1 %196 }
 0x190   :  { %v266_v29 = vmul.f32 %v197_v42, %v1528_v26 }
 0x191   :  { %v608_v1 = vpop.permute.xlu0 %607 }
 0x192   :  { %v699_v50 = vsel %vm693_vm0, %v249_v63, %v608_v1 }
 0x193   :  { %1195 = vmatmul.mubr.msk.f32.gmra.mxu1 %vm741_vm1, %v699_v50  ;;  %v202_v49 = vpop.permute.xlu1 %201 }
 0x195   :  { %v610_v54 = vpop.permute.xlu0 %609 }
 0x196   :  { %v700_v3 = vsel %vm693_vm0, %v250_v12, %v610_v54  ;;  %v261_v12 = vmul.f32 %v1996_v61, %v1573_v31  ;;  %v264_v61 = vmul.f32 %v187_v20, %v1546_v28  ;;  %v267_v28 = vmul.f32 %v202_v49, %v1519_v25 }
 0x197   :  { %1197 = vmatprep.mubr.msk.f32.mxu1 %vm741_vm1, %v700_v3  ;;  %v207_v56 = vpop.permute.xlu1 %206 }
 0x198   :  { %v268_v20 = vmul.f32 %v207_v56, %v1510_v24  ;;  %v2126_v56 = vld [vmem:[%s2292_s4] ss:$0 sm:$0xff] }
 0x199   :  { %v612_v11 = vpop.permute.xlu0 %611 }
 0x19a   :  { %v701_v59 = vsel %vm693_vm0, %v251_v4, %v612_v11  ;;  %v262_v4 = vmul.f32 %v2002_v13, %v1564_v30  ;;  %v265_v30 = vmul.f32 %v192_v33, %v1537_v27  ;;  %v718_v33 = vsel %vm693_vm0, %v268_v20, %v1973_v58  ;;  %v1312_v58 = vld [vmem:[%s2288_s0 + $0xd8] sm:$0xff] }
 0x19b   :  { %1198 = vmatmul.mubr.msk.f32.gmra.mxu1 %vm741_vm1, %v701_v59  ;;  %v212_v63 = vpop.permute.xlu1 %211 }
 0x19c   :  { %v269_v26 = vmul.f32 %v212_v63, %v1501_v23 }
 0x19d   :  { %v614_v17 = vpop.permute.xlu0 %613 }
 0x19e   :  { %v702_v10 = vsel %vm693_vm0, %v252_v7, %v614_v17  ;;  %v719_v25 = vsel %vm693_vm0, %v269_v26, %v1982_v51  ;;  %v1313_v51 = vld [vmem:[%s2288_s0 + $0xe0] sm:$0xff] }
 0x19f   :  { %1200 = vmatprep.mubr.msk.f32.mxu1 %vm741_vm1, %v702_v10  ;;  %v217_v3 = vpop.permute.xlu1 %216 }
 0x1a1   :  { %v616_v5 = vpop.permute.xlu0 %615 }
 0x1a2   :  { %v703_v21 = vsel %vm693_vm0, %v253_v9, %v616_v5 }
 0x1a3   :  { %1201 = vmatmul.mubr.msk.f32.gmra.mxu1 %vm741_vm1, %v703_v21  ;;  %v222_v59 = vpop.permute.xlu1 %221 }
 0x1a4   :  { %v271_v34 = vmul.f32 %v1312_v58, %v222_v59 }
 0x1a5   :  { %v618_v35 = vpop.permute.xlu0 %617 }
 0x1a6   :  { %v704_v36 = vsel %vm693_vm0, %v254_v18, %v618_v35  ;;  %v270_v35 = vmul.f32 %v217_v3, %v1494_v22 }
 0x1a7   :  { %1203 = vmatprep.mubr.msk.f32.mxu1 %vm741_vm1, %v704_v36  ;;  %v227_v10 = vpop.permute.xlu1 %226 }
 0x1a9   :  { %v620_v40 = vpop.permute.xlu0 %619 }
 0x1aa   :  { %v705_v44 = vsel %vm693_vm0, %v255_v37, %v620_v40  ;;  %v272_v40 = vmul.f32 %v1313_v51, %v227_v10 }
 0x1ab   :  { %1204 = vmatmul.mubr.msk.f32.gmra.mxu1 %vm741_vm1, %v705_v44  ;;  %v232_v6 = vpop.permute.xlu1 %231  ;;  %v1314_v44 = vld [vmem:[%s2288_s0 + $0xe8] sm:$0xff] }
 0x1ac   :  { %v273_v38 = vmul.f32 %v1314_v44, %v232_v6 }
 0x1ad   :  { %v622_v47 = vpop.permute.xlu0 %621 }
 0x1ae   :  { %v706_v2 = vsel %vm693_vm0, %v256_v45, %v622_v47 }
 0x1af   :  { %1206 = vmatprep.mubr.msk.f32.mxu1 %vm741_vm1, %v706_v2  ;;  %v237_v18 = vpop.permute.xlu1 %236 }
 0x1b1   :  { %v624_v19 = vpop.permute.xlu0 %623 }
 0x1b2   :  { %v707_v52 = vsel %vm693_vm0, %v257_v48, %v624_v19  ;;  %v274_v48 = vmul.f32 %v1315_v39, %v237_v18  ;;  %v1316_v19 = vld [vmem:[%s2288_s0 + $0xf8] sm:$0xff] }
 0x1b3   :  { %1207 = vmatmul.mubr.msk.f32.gmra.mxu1 %vm741_vm1, %v707_v52  ;;  %v242_v37 = vpop.permute.xlu1 %241 }
 0x1b4   :  { %v275_v52 = vmul.f32 %v1316_v19, %v242_v37 }
 0x1b5   :  { %v626_v15 = vpop.permute.xlu0 %625 }
 0x1b6   :  { %v708_v57 = vsel %vm693_vm0, %v258_v55, %v626_v15 }
 0x1b7   :  { %1209 = vmatprep.mubr.msk.f32.mxu1 %vm741_vm1, %v708_v57  ;;  %v656_v42 = vpop.permute.xlu1 %655 }
 0x1b8   :  { %v723_v2 = vsel %vm693_vm0, %v273_v38, %v656_v42 }
 0x1b9   :  { %v628_v14 = vpop.permute.xlu0 %627 }
 0x1ba   :  { %v709_v46 = vsel %vm693_vm0, %v259_v60, %v628_v14 }
 0x1bb   :  { %1210 = vmatmul.mubr.msk.f32.gmra.mxu1 %vm741_vm1, %v709_v46  ;;  %v660_v49 = vpop.permute.xlu1 %659 }
 0x1bc   :  { %v725_v15 = vsel %vm693_vm0, %v275_v52, %v660_v49 }
 0x1bd   :  { %v630_v1 = vpop.permute.xlu0 %629 }
 0x1be   :  { %v710_v50 = vsel %vm693_vm0, %v260_v62, %v630_v1 }
 0x1bf   :  { %1212 = vmatprep.mubr.msk.f32.mxu1 %vm741_vm1, %v710_v50 }
 0x1c1   :  { %v632_v54 = vpop.permute.xlu0 %631 }
 0x1c2   :  { %v711_v16 = vsel %vm693_vm0, %v261_v12, %v632_v54 }
 0x1c3   :  { %1213 = vmatmul.mubr.msk.f32.gmra.mxu1 %vm741_vm1, %v711_v16 }
 0x1c5   :  { %v634_v11 = vpop.permute.xlu0 %633 }
 0x1c6   :  { %v712_v32 = vsel %vm693_vm0, %v262_v4, %v634_v11 }
 0x1c7   :  { %1215 = vmatprep.mubr.msk.f32.mxu1 %vm741_vm1, %v712_v32 }
 0x1c9   :  { %v636_v7 = vpop.permute.xlu0 %635 }
 0x1ca   :  { %v713_v31 = vsel %vm693_vm0, %v263_v53, %v636_v7 }
 0x1cb   :  { %1216 = vmatmul.mubr.msk.f32.gmra.mxu1 %vm741_vm1, %v713_v31 }
 0x1cd   :  { %v638_v17 = vpop.permute.xlu0 %637 }
 0x1ce   :  { %v714_v0 = vsel %vm693_vm0, %v264_v61, %v638_v17 }
 0x1cf   :  { %1218 = vmatprep.mubr.msk.f32.mxu1 %vm741_vm1, %v714_v0 }
 0x1d1   :  { %v640_v13 = vpop.permute.xlu0 %639 }
 0x1d2   :  { %v715_v9 = vsel %vm693_vm0, %v265_v30, %v640_v13 }
 0x1d3   :  { %1219 = vmatmul.mubr.msk.f32.gmra.mxu1 %vm741_vm1, %v715_v9 }
 0x1d5   :  { %v642_v5 = vpop.permute.xlu0 %641 }
 0x1d6   :  { %v716_v21 = vsel %vm693_vm0, %v266_v29, %v642_v5 }
 0x1d7   :  { %1221 = vmatprep.mubr.msk.f32.mxu1 %vm741_vm1, %v716_v21 }
 0x1d9   :  { %v644_v8 = vpop.permute.xlu0 %643 }
 0x1da   :  { %v717_v27 = vsel %vm693_vm0, %v267_v28, %v644_v8 }
 0x1db   :  { %1222 = vmatmul.mubr.msk.f32.gmra.mxu1 %vm741_vm1, %v717_v27 }
 0x1dc   :  { %1224 = vmatprep.mubr.msk.f32.mxu1 %vm741_vm1, %v718_v33 }
 0x1dd   :  { %v650_v36 = vpop.permute.xlu0 %649 }
 0x1de   :  { %v720_v24 = vsel %vm693_vm0, %v270_v35, %v650_v36 }
 0x1df   :  { %1225 = vmatmul.mubr.msk.f32.gmra.mxu1 %vm741_vm1, %v719_v25 }
 0x1e0   :  { %1227 = vmatprep.mubr.msk.f32.mxu1 %vm741_vm1, %v720_v24 }
 0x1e1   :  { %v652_v23 = vpop.permute.xlu0 %651 }
 0x1e2   :  { %v721_v22 = vsel %vm693_vm0, %v271_v34, %v652_v23 }
 0x1e3   :  { %1228 = vmatmul.mubr.msk.f32.gmra.mxu1 %vm741_vm1, %v721_v22 }
 0x1e5   :  { %v654_v45 = vpop.permute.xlu0 %653 }
 0x1e6   :  { %v722_v47 = vsel %vm693_vm0, %v272_v40, %v654_v45 }
 0x1e7   :  { %1230 = vmatprep.mubr.msk.f32.mxu1 %vm741_vm1, %v722_v47 }
 0x1e8   :  { %1231 = vmatmul.mubr.msk.f32.gmra.mxu1 %vm741_vm1, %v723_v2 }
 0x1e9   :  { %v658_v41 = vpop.permute.xlu0 %657 }
 0x1ea   :  { %v724_v55 = vsel %vm693_vm0, %v274_v48, %v658_v41 }
 0x1eb   :  { %1233 = vmatprep.mubr.msk.f32.mxu1 %vm741_vm1, %v724_v55 }
 0x1ec   :  { %1234 = vmatmul.mubr.msk.f32.gmra.mxu1 %vm741_vm1, %v725_v15 }
 0x23f   :  { %v1190_v57 = vpop.f32.mrf.mxu1 }
 0x240   :  { %v910_v43 = vadd.f32 %v1190_v57, %v2126_v56 }
 0x241   :  { %v904_v60 = vpop.f32.mrf.mxu1 }
 0x242   :  { %1064 = vst.msk [vmem:[%s2293_s5 + $0x8] sm:$0xff] %vm741_vm1, %v910_v43  ;;  %v905_v14 = vadd.f32 %v2126_v56, %v904_v60 }
 0x244   :  { %1063 = vst.msk [vmem:[%s2293_s5] sm:$0xff] %vm741_vm1, %v905_v14 }
 0x24b   :  { %v1193_v46 = vpop.f32.mrf.mxu1 }
 0x24c   :  { %v920_v62 = vadd.f32 %v1193_v46, %v2126_v56 }
 0x24d   :  { %v914_v63 = vpop.f32.mrf.mxu1 }
 0x24e   :  { %1066 = vst.msk [vmem:[%s2293_s5 + $0x18] sm:$0xff] %vm741_vm1, %v920_v62  ;;  %v915_v1 = vadd.f32 %v2126_v56, %v914_v63 }
 0x250   :  { %1065 = vst.msk [vmem:[%s2293_s5 + $0x10] sm:$0xff] %vm741_vm1, %v915_v1 }
 0x253   :  { %v1196_v50 = vpop.f32.mrf.mxu1 }
 0x254   :  { %v930_v12 = vadd.f32 %v1196_v50, %v2126_v56 }
 0x255   :  { %v924_v54 = vpop.f32.mrf.mxu1 }
 0x256   :  { %1068 = vst.msk [vmem:[%s2293_s5 + $0x28] sm:$0xff] %vm741_vm1, %v930_v12  ;;  %v925_v3 = vadd.f32 %v2126_v56, %v924_v54 }
 0x258   :  { %1067 = vst.msk [vmem:[%s2293_s5 + $0x20] sm:$0xff] %vm741_vm1, %v925_v3 }
 0x25b   :  { %v1199_v16 = vpop.f32.mrf.mxu1 }
 0x25c   :  { %v940_v4 = vadd.f32 %v1199_v16, %v2126_v56 }
 0x25d   :  { %v934_v11 = vpop.f32.mrf.mxu1 }
 0x25e   :  { %1070 = vst.msk [vmem:[%s2293_s5 + $0x38] sm:$0xff] %vm741_vm1, %v940_v4  ;;  %v935_v32 = vadd.f32 %v2126_v56, %v934_v11 }
 0x260   :  { %1069 = vst.msk [vmem:[%s2293_s5 + $0x30] sm:$0xff] %vm741_vm1, %v935_v32 }
 0x263   :  { %v1202_v53 = vpop.f32.mrf.mxu1 }
 0x264   :  { %v950_v59 = vadd.f32 %v1202_v53, %v2126_v56 }
 0x265   :  { %v944_v7 = vpop.f32.mrf.mxu1 }
 0x266   :  { %1072 = vst.msk [vmem:[%s2293_s5 + $0x48] sm:$0xff] %vm741_vm1, %v950_v59  ;;  %v945_v31 = vadd.f32 %v2126_v56, %v944_v7 }
 0x268   :  { %1071 = vst.msk [vmem:[%s2293_s5 + $0x40] sm:$0xff] %vm741_vm1, %v945_v31 }
 0x26b   :  { %v1205_v61 = vpop.f32.mrf.mxu1 }
 0x26c   :  { %v960_v17 = vadd.f32 %v1205_v61, %v2126_v56 }
 0x26d   :  { %v954_v10 = vpop.f32.mrf.mxu1 }
 0x26e   :  { %1074 = vst.msk [vmem:[%s2293_s5 + $0x58] sm:$0xff] %vm741_vm1, %v960_v17  ;;  %v955_v0 = vadd.f32 %v2126_v56, %v954_v10 }
 0x270   :  { %1073 = vst.msk [vmem:[%s2293_s5 + $0x50] sm:$0xff] %vm741_vm1, %v955_v0 }
 0x273   :  { %v1208_v30 = vpop.f32.mrf.mxu1 }
 0x274   :  { %v970_v13 = vadd.f32 %v1208_v30, %v2126_v56 }
 0x275   :  { %v964_v9 = vpop.f32.mrf.mxu1 }
 0x276   :  { %1076 = vst.msk [vmem:[%s2293_s5 + $0x68] sm:$0xff] %vm741_vm1, %v970_v13  ;;  %v965_v29 = vadd.f32 %v2126_v56, %v964_v9 }
 0x278   :  { %1075 = vst.msk [vmem:[%s2293_s5 + $0x60] sm:$0xff] %vm741_vm1, %v965_v29 }
 0x27b   :  { %v1211_v6 = vpop.f32.mrf.mxu1 }
 0x27c   :  { %v980_v5 = vadd.f32 %v1211_v6, %v2126_v56 }
 0x27d   :  { %v974_v21 = vpop.f32.mrf.mxu1 }
 0x27e   :  { %1078 = vst.msk [vmem:[%s2293_s5 + $0x78] sm:$0xff] %vm741_vm1, %v980_v5  ;;  %v975_v28 = vadd.f32 %v2126_v56, %v974_v21 }
 0x280   :  { %1077 = vst.msk [vmem:[%s2293_s5 + $0x70] sm:$0xff] %vm741_vm1, %v975_v28 }
 0x283   :  { %v1214_v20 = vpop.f32.mrf.mxu1 }
 0x284   :  { %v990_v8 = vadd.f32 %v1214_v20, %v2126_v56 }
 0x285   :  { %v984_v18 = vpop.f32.mrf.mxu1 }
 0x286   :  { %1080 = vst.msk [vmem:[%s2293_s5 + $0x88] sm:$0xff] %vm741_vm1, %v990_v8  ;;  %v985_v27 = vadd.f32 %v2126_v56, %v984_v18 }
 0x288   :  { %1079 = vst.msk [vmem:[%s2293_s5 + $0x80] sm:$0xff] %vm741_vm1, %v985_v27 }
 0x28b   :  { %v1217_v33 = vpop.f32.mrf.mxu1 }
 0x28c   :  { %v1000_v26 = vadd.f32 %v1217_v33, %v2126_v56 }
 0x28d   :  { %v994_v35 = vpop.f32.mrf.mxu1 }
 0x28e   :  { %1082 = vst.msk [vmem:[%s2293_s5 + $0x98] sm:$0xff] %vm741_vm1, %v1000_v26  ;;  %v995_v36 = vadd.f32 %v2126_v56, %v994_v35 }
 0x290   :  { %1081 = vst.msk [vmem:[%s2293_s5 + $0x90] sm:$0xff] %vm741_vm1, %v995_v36 }
 0x293   :  { %v1220_v25 = vpop.f32.mrf.mxu1 }
 0x294   :  { %v1010_v24 = vadd.f32 %v1220_v25, %v2126_v56 }
 0x295   :  { %v1004_v58 = vpop.f32.mrf.mxu1 }
 0x296   :  { %1084 = vst.msk [vmem:[%s2293_s5 + $0xa8] sm:$0xff] %vm741_vm1, %v1010_v24  ;;  %v1005_v34 = vadd.f32 %v2126_v56, %v1004_v58 }
 0x298   :  { %1083 = vst.msk [vmem:[%s2293_s5 + $0xa0] sm:$0xff] %vm741_vm1, %v1005_v34 }
 0x29b   :  { %v1223_v37 = vpop.f32.mrf.mxu1 }
 0x29c   :  { %v1020_v23 = vadd.f32 %v1223_v37, %v2126_v56 }
 0x29d   :  { %v1014_v22 = vpop.f32.mrf.mxu1 }
 0x29e   :  { %1086 = vst.msk [vmem:[%s2293_s5 + $0xb8] sm:$0xff] %vm741_vm1, %v1020_v23  ;;  %v1015_v51 = vadd.f32 %v2126_v56, %v1014_v22 }
 0x29f   :  { %v1226_v40 = vpop.f32.mrf.mxu1 }
 0x2a0   :  { %1085 = vst.msk [vmem:[%s2293_s5 + $0xb0] sm:$0xff] %vm741_vm1, %v1015_v51  ;;  %v1030_v42 = vadd.f32 %v1226_v40, %v2126_v56 }
 0x2a1   :  { %v1024_v44 = vpop.f32.mrf.mxu1 }
 0x2a2   :  { %1088 = vst.msk [vmem:[%s2293_s5 + $0xc8] sm:$0xff] %vm741_vm1, %v1030_v42  ;;  %v1025_v38 = vadd.f32 %v2126_v56, %v1024_v44 }
 0x2a3   :  { %v1229_v45 = vpop.f32.mrf.mxu1 }
 0x2a4   :  { %1087 = vst.msk [vmem:[%s2293_s5 + $0xc0] sm:$0xff] %vm741_vm1, %v1025_v38  ;;  %v1040_v47 = vadd.f32 %v1229_v45, %v2126_v56 }
 0x2a5   :  { %v1034_v2 = vpop.f32.mrf.mxu1 }
 0x2a6   :  { %1090 = vst.msk [vmem:[%s2293_s5 + $0xd8] sm:$0xff] %vm741_vm1, %v1040_v47  ;;  %v1035_v39 = vadd.f32 %v2126_v56, %v1034_v2 }
 0x2a8   :  { %1089 = vst.msk [vmem:[%s2293_s5 + $0xd0] sm:$0xff] %vm741_vm1, %v1035_v39  ;;  %v1232_v48 = vpop.f32.mrf.mxu1 }
 0x2a9   :  { %v1050_v49 = vadd.f32 %v1232_v48, %v2126_v56 }
 0x2aa   :  { %v1044_v19 = vpop.f32.mrf.mxu1 }
 0x2ab   :  { %1092 = vst.msk [vmem:[%s2293_s5 + $0xe8] sm:$0xff] %vm741_vm1, %v1050_v49  ;;  %v1045_v52 = vadd.f32 %v2126_v56, %v1044_v19 }
 0x2ac   :  { %v1235_v41 = vpop.f32.mrf.mxu1 }
 0x2ad   :  { %1091 = vst.msk [vmem:[%s2293_s5 + $0xe0] sm:$0xff] %vm741_vm1, %v1045_v52  ;;  %v1060_v55 = vadd.f32 %v1235_v41, %v2126_v56 }
 0x2ae   :  { %v1054_v15 = vpop.f32.mrf.mxu1 }
 0x2af   :  { %1094 = vst.msk [vmem:[%s2293_s5 + $0xf8] sm:$0xff] %vm741_vm1, %v1060_v55  ;;  %v1055_v57 = vadd.f32 %v2126_v56, %v1054_v15 }
 0x2b1   :  { %1093 = vst.msk [vmem:[%s2293_s5 + $0xf0] sm:$0xff] %vm741_vm1, %v1055_v57 }

</bundles_post_ra>
